<compile_context>
chip_gen: v7x
topology: tpu7x:2x2x1
jax: 0.10.0
libtpu: 0.0.40
codegen_flags: <defaults>
</compile_context>

<pallas_src>
import jax
import jax.numpy as jnp
from jax.experimental import pallas as pl
from jax.experimental.pallas import tpu as pltpu

_LANE = 128        # lane width
_TL_TARGET = 2048  # lane-tile target (multiple of 128)
_TR_TARGET = 256   # row-tile target (multiple of 8)


def _round_up(v: int, m: int) -> int:
    return ((v + m - 1) // m) * m


def _chomp_copy_kernel(x_ref, o_ref):
    # Pure lane-dense relay: input and output blocks are the same window of
    # the kept prefix. The final (partial) L / row tiles are clamped on the
    # edge read and masked on the output store by Pallas.
    o_ref[...] = x_ref[...]


def chomp1d(x: jax.Array, chomp_size: int) -> jax.Array:
    """Pallas equivalent of Chomp1d(chomp_size)(x) for x of shape (N, C, L)."""
    n, c, l = x.shape
    assert 0 <= chomp_size < l, "chomp_size must be in [0, L)"
    if chomp_size == 0:
        # PyTorch would .contiguous()-copy; identity is harmless under JAX
        # immutability.
        return x
    l_out = l - chomp_size

    # Tiny-output cutoff: sub-128-lane outputs would force masked vst.msk
    # stores and the fixed pallas_call cost dominates; let XLA slice-copy.
    if l_out < _LANE:
        return x[:, :, :l_out]

    # Flatten batch x channel so the row tile is independent of C (free).
    r = n * c
    x2 = x.reshape(r, l)

    # ---- lane (L) tiles: balanced, multiples of 128, never wider than L_out.
    floor_l = (l_out // _LANE) * _LANE                          # >= 128 here
    n_l = max(pl.cdiv(l_out, _TL_TARGET), pl.cdiv(l_out, floor_l))
    tl = _round_up(pl.cdiv(l_out, n_l), _LANE)

    # ---- row tiles: multiples of 8 (or the full, exempt extent). When there
    # are enough rows, split into >= 2 roughly equal tiles so the leading
    # parallel axis feeds both v7x TensorCores.
    if r < 8:
        tr = r
    elif r <= 2 * _TR_TARGET:
        tr = _round_up(pl.cdiv(r, 2), 8)
    else:
        tr = _TR_TARGET

    grid = (pl.cdiv(r, tr), pl.cdiv(l_out, tl))
    bytes_moved = 2 * r * l_out * x.dtype.itemsize              # HBM read + write

    out2 = pl.pallas_call(
        _chomp_copy_kernel,
        out_shape=jax.ShapeDtypeStruct((r, l_out), x.dtype),
        grid_spec=pltpu.PrefetchScalarGridSpec(
            num_scalar_prefetch=0,
            grid=grid,
            # Prefix keep -> output block (ri, li) maps 1:1 to input block.
            in_specs=[pl.BlockSpec((tr, tl), lambda ri, li: (ri, li))],
            out_specs=pl.BlockSpec((tr, tl), lambda ri, li: (ri, li)),
        ),
        compiler_params=pltpu.CompilerParams(
            # Pure element-parallel copy: let megacore split the grid.
            dimension_semantics=("parallel", "parallel"),
        ),
        cost_estimate=pl.CostEstimate(
            flops=0, transcendentals=0, bytes_accessed=bytes_moved
        ),
    )(x2)

    return out2.reshape(n, c, l_out)


if __name__ == "__main__":
    key = jax.random.PRNGKey(0)

    # 1) Small TCN-branch shape: L_out < 128 -> native-slice fallback path.
    N, C, L = 2, 4, 16
    chomp_size = 3  # padding = (kernel_size - 1) * dilation
    x = jax.random.normal(key, (N, C, L), dtype=jnp.float32)
    out = jax.block_until_ready(chomp1d(x, chomp_size))
    ref = x[:, :, :-chomp_size]
    assert out.shape == (N, C, L - chomp_size), out.shape
    assert out.dtype == x.dtype
    assert bool(jnp.array_equal(out, ref))

    # 2) Pallas tiled path: N*C = 16 rows -> two row tiles (v7x core split),
    #    L_out = 349 -> lane tiles of 256 with a masked final store.
    N2, C2, L2, chomp2 = 2, 8, 384, 35
    x2 = jax.random.normal(jax.random.PRNGKey(0), (N2, C2, L2), dtype=jnp.float32)
    out2 = jax.block_until_ready(chomp1d(x2, chomp2))
    ref2 = x2[:, :, :-chomp2]
    assert out2.shape == (N2, C2, L2 - chomp2), out2.shape
    assert bool(jnp.array_equal(out2, ref2))

    # 3) Typical TCN channel count with longer sequence: exercises balanced
    #    lane tiling (no thin remainder) and a masked final row tile.
    N3, C3, L3, chomp3 = 1, 25, 2200, 8
    x3 = jax.random.normal(jax.random.PRNGKey(0), (N3, C3, L3), dtype=jnp.float32)
    out3 = jax.block_until_ready(chomp1d(x3, chomp3))
    ref3 = x3[:, :, :-chomp3]
    assert out3.shape == (N3, C3, L3 - chomp3), out3.shape
    assert bool(jnp.array_equal(out3, ref3))

    print("KERNEL_OK")
</pallas_src>

<mosaic_0001>
module attributes {stable_mosaic.version = 11 : i64} {
  func.func @_chomp_copy_kernel(%arg0: i32, %arg1: i32, %arg2: memref<8x256xf32, #tpu.memory_space<vmem>>, %arg3: memref<8x256xf32, #tpu.memory_space<vmem>>) attributes {dimension_semantics = [#tpu.dimension_semantics<parallel>, #tpu.dimension_semantics<parallel>], iteration_bounds = array<i64: 2, 2>, scalar_prefetch = 0 : i64, scratch_operands = 0 : i64, tpu.core_type = #tpu.core_type<tc>, window_params = [{transform_indices = @transform_0, window_bounds = array<i64: 8, 256>}, {transform_indices = @transform_1, window_bounds = array<i64: 8, 256>}]} {
    %c0 = arith.constant 0 : index
    %c0_0 = arith.constant 0 : index
    %0 = vector.load %arg2[%c0, %c0_0] : memref<8x256xf32, #tpu.memory_space<vmem>>, vector<8x256xf32>
    %c0_1 = arith.constant 0 : index
    %c0_2 = arith.constant 0 : index
    %1 = vector.load %arg3[%c0_1, %c0_2] : memref<8x256xf32, #tpu.memory_space<vmem>>, vector<8x256xf32>
    tpu.vector_store %arg3[%c0_1, %c0_2], %0 {strides = array<i32>} : memref<8x256xf32, #tpu.memory_space<vmem>>, vector<8x256xf32>,
    return
  }
  func.func @transform_0(%arg0: i32, %arg1: i32) -> (i32, i32) {
    %c0_i32 = arith.constant 0 : i32
    return %arg0, %arg1 : i32, i32
  }
  func.func @transform_1(%arg0: i32, %arg1: i32) -> (i32, i32) {
    %c0_i32 = arith.constant 0 : i32
    return %arg0, %arg1 : i32, i32
  }
}

</mosaic_0001>

<bundles_post_ra>
// kernel: tpu_custom_call.1
= control target key start
LH: loop header
LB: loop body
LE: loop exit
PB: predicated region body
PF: predicated region fallthrough
CT: control target
= control target key end

     0   :  { %6 = vsyncpa [#allocation3], 0  ;;  %s709_s0 = inlined_call_operand.hbm [shape: f32[16,384], index: 0, kind: input, shape index: {}]   ;;  %s710_s1 = inlined_call_operand.hbm [shape: f32[16,349], index: 1, kind: output, shape index: {}]  }
   0x1   :  { %8 = vsyncpa [#allocation3 + $0x1], 0 }
   0x2   :  { %9 = vsyncpa [#allocation4], 0 }
   0x3   :  { %11 = vsyncpa [#allocation4 + $0x1], 0  ;;  %s517_s6 = smov 0   ;;  %s519_s7 = smov 0  }
   0x4   :  { %s521_s8 = smov 0   ;;  %s523_s9 = smov 0  }
   0x5   :  { %s525_s10 = smov 0   ;;  %s527_s11 = smov 0  }
   0x6   :  { %s529_s12 = smov 0   ;;  %s531_s13 = smov 0  }
   0x7 LB: > { %s281_s14 = sadd.s32 4294967295, %s503_s13   ;;  %s282_s15 = sadd.s32 4294967294, %s503_s13   ;;  %s503_s13 = sphi %s531_s13, %s17_s13   ;;  %s499_s12 = sphi %s529_s12, %s728_s12   ;;  %s495_s11 = sphi %s527_s11, %s727_s11   ;;  %s491_s10 = sphi %s525_s10, %s726_s10   ;;  %s487_s9 = sphi %s523_s9, %s725_s9   ;;  %s483_s8 = sphi %s521_s8, %s724_s8   ;;  %s479_s7 = sphi %s519_s7, %s723_s7   ;;  %s475_s6 = sphi %s517_s6, %s722_s6  }
   0x8   : > { %s26_s16 = sadd.s32 1, %s495_s11  ;;  %s29_s17 = sadd.s32 1, %s499_s12 }
   0x9   : > { %p27_p0 = scmp.ge.s32.totalorder %s26_s16, 2  ;;  %p45_p1 = scmp.ne.s32.totalorder %s483_s8, %s479_s7 }
   0xa   : > { %p46_p2 = scmp.eq.s32.totalorder %s503_s13, 0  ;;  %p51_p5 = scmp.ne.s32.totalorder %s479_s7, %s475_s6 }
   0xb   : > { %s730_s16 = smov (%p27_p0, %s26_s16), 0  ;;  %s732_s17 = smov (!%p27_p0, %s29_s17), %s499_s12 }
   0xc   : > { %713 = sst [smem:[#allocation8_spill]] %s730_s16  ;;  %s34_s18 = ssub.s32 %s495_s11, %s730_s16 }
   0xd   : > { %p569_p3 = por %p46_p2, %p45_p1  ;;  %p31_p4 = scmp.ge.s32.totalorder %s732_s17, 2 }
   0xe   : > { %p52_p6 = scmp.eq.s32.totalorder %s281_s14, 0  ;;  %p77_p7 = scmp.eq.s32.totalorder %s281_s14, 3 }
   0xf   : > { %s734_s17 = smov (%p31_p4, %s732_s17), 0  ;;  %p83_p10 = scmp.eq.s32.totalorder %s282_s15, 3 }
  0x10   : > { %715 = sst [smem:[#allocation9_spill]] %s734_s17  ;;  %p577_p8 = por %p52_p6, %p51_p5 }
  0x11   : > { %p581_p9 = por %p77_p7, %p45_p1  ;;  %s33_s22 = ssub.s32 %s499_s12, %s734_s17 }
  0x12   : > { %s35_s23 = sor.u32 %s34_s18, %s33_s22  ;;  %s38_s24 = sadd.s32 1, %s483_s8 }
  0x13   : > { %p36_p11 = scmp.eq.s32.totalorder %s35_s23, 0  ;;  %p588_p12 = por %p83_p10, %p51_p5 }
  0x14   : > { %p284_p13 = scmp.ge.s32.totalorder %s503_s13, 4 }
  0x15   : > { %s718_s25 = scalar_select %p588_p12, 1, 0 }
  0x16   : > { %s593_s26 = scalar_select %p36_p11, %s483_s8, %s38_s24  }
  0x17   : > { %99 = sbr.rel (%p284_p13) target bundleno = 66 (0x42), region = 16 }
  0x1e   : > { %102 = sbr.rel (!%p569_p3) target bundleno = 66 (0x42), region = 20  ;;  %s103_s27 = sand.u32 (%p569_p3), 1, %s483_s8  }
  0x1f   : > { %s286_s28 = sshll.u32 (%p569_p3), %s495_s11, 1  ;;  %s285_s29 = sshll.u32 (%p569_p3), %s103_s27, 4 }
  0x20   : > { %s109_s30 = ssub.s32 (%p569_p3), 3, %s286_s28  ;;  %s603_s4 = scalar_lea.sflag (%p569_p3), [#allocation3], %s103_s27 }
  0x21   : > { %p110_p0 = scmp.lt.s32.totalorder (%p569_p3), %s109_s30, 2  ;;  %s107_s5 = scalar_lea.vmem (%p569_p3), [#allocation2], %s285_s29 }
  0x25   : > { %s736_s30 = smov (!%p110_p0, %s109_s30), 2 }
  0x26   : > { %s600_s2 = sshll.u32 %s736_s30, 7 }
  0x27   : > { %s114_s3 = ssub.s32 256, %s600_s2 }
  0x28   : > { %115 = vsyncadd %s603_s4, %s114_s3  ;;  %s304_s14 = smul.u32 3, %s499_s12  ;;  %p288_p1 = scmp.ne.s32.totalorder %s600_s2, 0 }
  0x29   : > { %s123_s15 = sshll.u32 %s107_s5, 4  ;;  %s381_s3 = scalar_lea.hbm %s709_s0, 768  ;;  %s608_s15 = int_to_ptr.vmem [resolvable:$true] %s123_s15 }
  0x2a   : > { %s118_s18 = sadd.s32 %s304_s14, %s286_s28 }
  0x2b   : > { %s289_s19 = sshll.u32 %s118_s18, 7 }
  0x2c   : > { %s120_s24 = scalar_lea.hbm %s709_s0, %s289_s19 }
  0x2d   : > { %s377_s27 = scalar_lea.hbm %s120_s24, %s600_s2  ;;  %p382_p5 = scmp.lt.u32.totalorder %s120_s24, %s709_s0 }
  0x2e   : > { %p378_p2 = scmp.ne.s32.totalorder %s120_s24, %s377_s27  ;;  %p383_p6 = scmp.lt.u32.totalorder %s381_s3, %s377_s27 }
  0x2f   : > { %p385_p10 = scmp.lt.u32.totalorder %s377_s27, %s120_s24 }
  0x30   : > { %p379_p3 = pnand %p378_p2, %p288_p1  ;;  %p384_p7 = por %p383_p6, %p382_p5 }
  0x32   : > { %p380_p4 = pneg %p379_p3  ;;  %p386_p11 = por %p385_p10, %p384_p7 }
  0x34   : > { %p387_p13 = pnand %p386_p11, %p380_p4 }
  0x36   : > { %390 = shalt.err (!%p387_p13)
}
  0x37   : > { %s391_s28 = scalar_lea.vmem %s608_s15, %s600_s2  ;;  %s505_s5 = smov [#allocation2]  }
  0x38   : > { %p392_p0 = scmp.ne.s32.totalorder %s608_s15, %s391_s28  ;;  %s395_s14 = sshll.u32 %s505_s5, 4  ;;  %s396_s14 = int_to_ptr.vmem [resolvable:$false] %s395_s14 }
  0x39   : > { %s397_s16 = scalar_lea.vmem %s396_s14, 512  ;;  %p398_p12 = scmp.lt.s32.totalorder %s608_s15, %s396_s14 }
  0x3a   : > { %p393_p2 = pnand %p392_p0, %p288_p1  ;;  %p399_p5 = scmp.lt.s32.totalorder %s397_s16, %s391_s28 }
  0x3c   : > { %p394_p3 = pneg %p393_p2  ;;  %p400_p6 = por %p399_p5, %p398_p12 }
  0x3e   : > { %p401_p7 = pnand %p400_p6, %p394_p3 }
  0x40   : > { %404 = shalt.err (!%p401_p7)
}
  0x41   : > { %126 = dma.hbm_to_vmem [thread:$0]  (%p288_p1), %s120_s24, %s600_s2, %s608_s15, %s603_s4  }
  0x42 PF: > { %p292_p4 = scmp.ge.s32.totalorder %s503_s13, 1  ;;  %p128_p10 = scmp.lt.s32.totalorder %s503_s13, 5 }
  0x44   : > { %p129_p11 = pnand %p292_p4, %p128_p10 }
  0x45   : > { %s636_s17 = sand.u32 (!%p129_p11), 1, %s479_s7  }
  0x46   : > { %132 = sbr.rel (%p129_p11) target bundleno = 114 (0x72), region = 24  ;;  %s293_s18 = sshll.u32 (!%p129_p11), %s636_s17, 4 }
  0x47   : > { %s135_s19 = scalar_lea.sflag (!%p129_p11), [#allocation3], %s636_s17  ;;  %s138_s22 = scalar_lea.vmem (!%p129_p11), [#allocation2], %s293_s18 }
  0x4d   : > { %466 = dma.done.wait (%p577_p8), %s135_s19, 256  }
  0x4e   : > { %468 = vsyncadd (%p577_p8), %s135_s19, 4294967040  ;;  %v167_v0 = vld [vmem:[%s138_s22] sm:$0xff]  ;;  %v168_v1 = vld [vmem:[%s138_s22 + $0x8] sm:$0xff]  ;;  %s156_s2 = scalar_lea.vmem [#allocation5], %s293_s18  ;;  %s172_s4 = scalar_lea.sflag [#allocation4], %s636_s17 }
  0x4f   : > { %169 = vst [vmem:[%s156_s2] sm:$0xff] %v167_v0  ;;  %170 = vst [vmem:[%s156_s2 + $0x8] sm:$0xff] %v168_v1  ;;  %178 = sbr.rel (!%p581_p9) target bundleno = 114 (0x72), region = 32  ;;  %s296_s15 = sshll.u32 (%p581_p9), %s487_s9, 1 }
  0x50   : > { %s180_s23 = ssub.s32 (%p581_p9), 3, %s296_s15 }
  0x51   : > { %p181_p12 = scmp.lt.s32.totalorder (%p581_p9), %s180_s23, 2 }
  0x56   : > { %s738_s23 = smov (!%p181_p12, %s180_s23), 2 }
  0x57   : > { %s648_s24 = sshll.u32 %s738_s23, 7 }
  0x58   : > { %s185_s20 = ssub.s32 256, %s648_s24 }
  0x59   : > { %186 = vsyncadd %s172_s4, %s185_s20  ;;  %s305_s27 = smul.u32 3, %s491_s10  ;;  %p298_p8 = scmp.ne.s32.totalorder %s648_s24, 0 }
  0x5a   : > { %s194_s21 = sshll.u32 %s156_s2, 4  ;;  %s506_s14 = smov [#allocation5]   ;;  %s655_s21 = int_to_ptr.vmem [resolvable:$true] %s194_s21 }
  0x5b   : > { %s189_s29 = sadd.s32 %s305_s27, %s296_s15  ;;  %s405_s5 = scalar_lea.vmem %s655_s21, %s648_s24 }
  0x5c   : > { %s299_s9 = sshll.u32 %s189_s29, 7  ;;  %p406_p9 = scmp.ne.s32.totalorder %s655_s21, %s405_s5 }
  0x5d   : > { %s191_s28 = scalar_lea.hbm %s710_s1, %s299_s9  ;;  %s409_s10 = sshll.u32 %s506_s14, 4  ;;  %s410_s10 = int_to_ptr.vmem [resolvable:$false] %s409_s10 }
  0x5e   : > { %p407_p1 = pnand %p406_p9, %p298_p8  ;;  %s411_s16 = scalar_lea.vmem %s410_s10, 512 }
  0x5f   : > { %p412_p0 = scmp.lt.s32.totalorder %s655_s21, %s410_s10  ;;  %p413_p2 = scmp.lt.s32.totalorder %s411_s16, %s405_s5 }
  0x60   : > { %p408_p13 = pneg %p407_p1 }
  0x61   : > { %p414_p3 = por %p413_p2, %p412_p0 }
  0x63   : > { %p415_p5 = pnand %p414_p3, %p408_p13 }
  0x65   : > { %418 = shalt.err (!%p415_p5)
}
  0x66   : > { %s419_s18 = scalar_lea.hbm %s191_s28, %s648_s24  ;;  %s423_s2 = scalar_lea.hbm %s710_s1, 768 }
  0x67   : > { %p420_p6 = scmp.ne.s32.totalorder %s191_s28, %s419_s18  ;;  %p424_p10 = scmp.lt.u32.totalorder %s191_s28, %s710_s1 }
  0x68   : > { %p425_p11 = scmp.lt.u32.totalorder %s423_s2, %s419_s18  ;;  %p427_p9 = scmp.lt.u32.totalorder %s419_s18, %s191_s28 }
  0x69   : > { %p421_p7 = pnand %p420_p6, %p298_p8 }
  0x6a   : > { %p426_p12 = por %p425_p11, %p424_p10 }
  0x6b   : > { %p422_p4 = pneg %p421_p7 }
  0x6c   : > { %p428_p1 = por %p427_p9, %p426_p12 }
  0x6e   : > { %p429_p13 = pnand %p428_p1, %p422_p4 }
  0x70   : > { %432 = shalt.err (!%p429_p13)
}
  0x71   : > { %197 = dma.vmem_to_hbm [thread:$0]  (%p298_p8), %s655_s21, %s648_s24, %s191_s28, %s172_s4  }
  0x72 PF: > { %p312_p0 = scmp.ge.s32.totalorder %s503_s13, 2  ;;  %s206_s20 = sand.u32 1, %s475_s6  }
  0x73   : > { %p719_p2 = scmp.ne.s32.totalorder %s718_s25, 0  ;;  %s207_s27 = scalar_lea.sflag [#allocation4], %s206_s20 }
  0x75   : > { %p309_p3 = pnand %p312_p0, %p719_p2 }
  0x77   : > { %470 = dma.done.wait (!%p309_p3), %s207_s27, 256  }
  0x78   : > { %472 = vsyncadd (!%p309_p3), %s207_s27, 4294967040  ;;  %s17_s13 = sadd.s32 1, %s503_s13   ;;  %s720_s17 = sld [smem:[#allocation8_spill]] }
  0x79   : > { %p14_p5 = scmp.ge.s32.totalorder %s17_s13, 6   ;;  %s721_s4 = sld [smem:[#allocation9_spill]] }
  0x7a   : > { %s722_s6 = smov %s479_s7  ;;  %s723_s7 = smov %s483_s8 }
  0x7b   : > { %s724_s8 = smov %s593_s26  ;;  %s725_s9 = smov %s495_s11 }
  0x7c   : > { %s726_s10 = smov %s499_s12  ;;  %16 = sbr.rel (!%p14_p5) target bundleno = 7 (0x7), region = 69 }
  0x7e   : > { %s727_s11 = smov %s720_s17 }
  0x7f   : > { %s728_s12 = smov %s721_s4 }
  0x83   :  { %212 = vsyncpa [#allocation3], 1 }
  0x84   :  { %214 = vsyncpa [#allocation3 + $0x1], 1 }
  0x85   :  { %215 = vsyncpa [#allocation4], 1 }
  0x86   :  { %217 = vsyncpa [#allocation4 + $0x1], 1 }

</bundles_post_ra>
